<compile_context>
chip_gen: v7x
topology: tpu7x:2x2x1
jax: 0.10.0
libtpu: 0.0.40
codegen_flags: <defaults>
</compile_context>

<pallas_src>
import functools

import jax
import jax.numpy as jnp
from jax.experimental import pallas as pl
from jax.experimental.pallas import tpu as pltpu

_LANE = 128
_MIN_TILE = 8 * _LANE  # 1024 rays = one full (8, 128) f32 vreg per component


def _focal_point_kernel(x_ref, p_ref, v_ref, out_ref, acc_ref, *, n_rays, nblocks, dim):
    c = pl.program_id(0)          # "core" axis (parallel)
    j = pl.program_id(1)          # reduction axis (arbitrary)

    @pl.when(j == 0)
    def _():
        acc_ref[...] = jnp.zeros_like(acc_ref)

    # Dense (TR, 128) component tiles -- full sublane utilisation.
    px = p_ref[0]
    py = p_ref[1]
    vx = v_ref[0]
    vy = v_ref[1]

    # D = X - P, with X broadcast from SMEM scalars.
    dx = x_ref[0] - px
    dy = x_ref[1] - py

    if dim == 2:
        # z components are implicitly zero: cross collapses to its z component.
        cz = dx * vy - dy * vx
        c_norm = jnp.abs(cz)                      # sqrt(cz^2) == |cz|  (VPU, not EUP)
        v2 = vx * vx + vy * vy
    else:
        pz = p_ref[2]
        vz = v_ref[2]
        dz = x_ref[2] - pz
        cx = dy * vz - dz * vy
        cy = dz * vx - dx * vz
        cz = dx * vy - dy * vx
        c_norm = jnp.sqrt(cx * cx + cy * cy + cz * cz)
        v2 = vx * vx + vy * vy + vz * vz

    # sqrt * rsqrt instead of divide (both EUP ops; avoids the 0*inf NaN trap
    # of the fused c2*rsqrt(c2*v2) form on zero-cross rays).
    dist = c_norm * jax.lax.rsqrt(v2)

    # Mask padded rays (zero-padded in the wrapper -> rsqrt(0) = inf) to 0.
    tr = acc_ref.shape[0]
    base = (c * nblocks + j) * (tr * _LANE)       # global index of this tile's first ray
    idx = (jax.lax.broadcasted_iota(jnp.int32, (tr, _LANE), 0) * _LANE
           + jax.lax.broadcasted_iota(jnp.int32, (tr, _LANE), 1))
    dist = jnp.where(idx < n_rays - base, dist, 0.0)

    # Purely elementwise accumulation in the steady state.
    acc_ref[...] += dist

    @pl.when(j == nblocks - 1)
    def _():
        out_ref[...] = jnp.sum(acc_ref[...], keepdims=True)


def focal_point_loss(P, V, X, loss, *, tile_n=65536, num_cores=2):
    """Pallas implementation of FocalPoint.forward's loss computation."""
    P = jnp.asarray(P, jnp.float32)
    V = jnp.asarray(V, jnp.float32)
    X = jnp.asarray(X, jnp.float32)
    loss = jnp.asarray(loss, jnp.float32)

    N, dim = P.shape
    assert V.shape == (N, dim) and X.shape == (dim,) and dim in (2, 3)

    # Never spin up a second "core" slot for inputs that fit in one min-tile:
    # that would just DMA + compute an all-padding block.
    NC = max(1, min(num_cores, -(-N // _MIN_TILE)))
    tile_n = max(_MIN_TILE, (tile_n // _MIN_TILE) * _MIN_TILE)

    # Clamp the tile for small inputs so we don't pad out to NC * tile_n rays.
    tile_eff = min(tile_n, -(-N // (NC * _MIN_TILE)) * _MIN_TILE)
    tile_eff = max(tile_eff, _MIN_TILE)
    TR = tile_eff // _LANE                       # sublane-rows per block (multiple of 8)

    chunk = NC * tile_eff
    n_padded = -(-N // chunk) * chunk
    nblocks = n_padded // chunk                  # reduction steps per core
    rows = n_padded // _LANE
    pad = n_padded - N

    # Zero-pad the ragged tail (masked to zero contribution inside the kernel)
    # and re-layout to lane-dense (dim, rows, 128). The pad + transpose +
    # reshape fuse into a single XLA copy producing the kernel-facing layout.
    Pp = jnp.pad(P, ((0, pad), (0, 0)))
    Vp = jnp.pad(V, ((0, pad), (0, 0)))
    P_l = Pp.T.reshape(dim, rows, _LANE)
    V_l = Vp.T.reshape(dim, rows, _LANE)

    kernel = functools.partial(
        _focal_point_kernel, n_rays=N, nblocks=nblocks, dim=dim)

    partials = pl.pallas_call(
        kernel,
        out_shape=jax.ShapeDtypeStruct((NC, 1), jnp.float32),
        grid_spec=pltpu.PrefetchScalarGridSpec(
            num_scalar_prefetch=0,
            grid=(NC, nblocks),
            in_specs=[
                # Target point X: a handful of f32 scalars -> SMEM, no VMEM tile.
                pl.BlockSpec(memory_space=pltpu.MemorySpace.SMEM),
                pl.BlockSpec((dim, TR, _LANE), lambda c, j: (0, c * nblocks + j, 0)),
                pl.BlockSpec((dim, TR, _LANE), lambda c, j: (0, c * nblocks + j, 0)),
            ],
            out_specs=pl.BlockSpec((1, 1), lambda c, j: (c, 0)),
            scratch_shapes=[pltpu.VMEM((TR, _LANE), jnp.float32)],
        ),
        compiler_params=pltpu.CompilerParams(
            dimension_semantics=("parallel", "arbitrary")),
    )(X, P_l, V_l)

    # Finalize in JAX: loss_out = loss_in + (sum of partials) / N.
    return loss + jnp.sum(partials) / jnp.float32(N)


def focal_point_ref(P, V, X, loss):
    """Pure-JAX reference mirroring the torch module."""
    P = jnp.asarray(P, jnp.float32)
    V = jnp.asarray(V, jnp.float32)
    X = jnp.asarray(X, jnp.float32)
    N, dim = P.shape
    if dim == 2:
        P = jnp.concatenate([P, jnp.zeros((N, 1), jnp.float32)], axis=1)
        V = jnp.concatenate([V, jnp.zeros((N, 1), jnp.float32)], axis=1)
        X = jnp.concatenate([X, jnp.zeros((1,), jnp.float32)], axis=0)
    cross = jnp.cross(X[None, :] - P, V)
    dist = jnp.linalg.norm(cross, axis=1) / jnp.linalg.norm(V, axis=1)
    return loss + dist.sum() / N


if __name__ == "__main__":
    key = jax.random.PRNGKey(0)
    k1, k2, k3, k4, k5, k6, k7, k8 = jax.random.split(key, 8)

    loss0 = jnp.float32(0.25)

    # 3D case, N not a multiple of the lane tile (exercises in-kernel masking
    # and the small-input single-core clamp).
    N3 = 200
    P3 = jax.random.normal(k1, (N3, 3), jnp.float32)
    V3 = jax.random.normal(k2, (N3, 3), jnp.float32) + 0.5  # norms away from 0
    X3 = jax.random.normal(k3, (3,), jnp.float32)
    out3 = jax.block_until_ready(focal_point_loss(P3, V3, X3, loss0))
    ref3 = focal_point_ref(P3, V3, X3, loss0)

    # 2D case (dim == 2 specialised branch of the kernel).
    N2 = 128
    P2 = jax.random.normal(k4, (N2, 2), jnp.float32)
    V2 = jax.random.normal(k5, (N2, 2), jnp.float32) + 0.5
    X2 = jax.random.normal(k6, (2,), jnp.float32)
    out2 = jax.block_until_ready(focal_point_loss(P2, V2, X2, loss0))
    ref2 = focal_point_ref(P2, V2, X2, loss0)

    # 3D case with a small forced tile so the reduction axis runs > 1 step
    # per core (exercises accumulation across grid steps + final writeback,
    # and the 2-core "parallel" axis).
    N3b = 5000
    P3b = jax.random.normal(k7, (N3b, 3), jnp.float32)
    V3b = jax.random.normal(k8, (N3b, 3), jnp.float32) + 0.5
    out3b = jax.block_until_ready(focal_point_loss(P3b, V3b, X3, loss0, tile_n=1024))
    ref3b = focal_point_ref(P3b, V3b, X3, loss0)

    assert jnp.allclose(out3, ref3, rtol=1e-5, atol=1e-5), (out3, ref3)
    assert jnp.allclose(out2, ref2, rtol=1e-5, atol=1e-5), (out2, ref2)
    assert jnp.allclose(out3b, ref3b, rtol=1e-5, atol=1e-5), (out3b, ref3b)
    print("KERNEL_OK")
</pallas_src>

<mosaic_0001>
module attributes {stable_mosaic.version = 11 : i64} {
  func.func @_focal_point_kernel(%arg0: i32, %arg1: i32, %arg2: memref<3xf32, #tpu.memory_space<smem>>, %arg3: memref<3x8x128xf32, #tpu.memory_space<vmem>>, %arg4: memref<3x8x128xf32, #tpu.memory_space<vmem>>, %arg5: memref<1x1xf32, #tpu.memory_space<vmem>>, %arg6: memref<8x128xf32, #tpu.memory_space<vmem>>) attributes {dimension_semantics = [#tpu.dimension_semantics<parallel>, #tpu.dimension_semantics<arbitrary>], iteration_bounds = array<i64: 1, 1>, scalar_prefetch = 0 : i64, scratch_operands = 1 : i64, tpu.core_type = #tpu.core_type<tc>, window_params = [{transform_indices = @transform_0, window_bounds = array<i64: 3>}, {transform_indices = @transform_1, window_bounds = array<i64: 3, 8, 128>}, {transform_indices = @transform_2, window_bounds = array<i64: 3, 8, 128>}, {transform_indices = @transform_3, window_bounds = array<i64: 1, 1>}]} {
    %c0_i32 = arith.constant 0 : i32
    %0 = arith.cmpi eq, %arg1, %c0_i32 : i32
    %1 = arith.extui %0 : i1 to i32
    %c0_i32_0 = arith.constant 0 : i32
    %2 = arith.cmpi ne, %1, %c0_i32_0 : i32
    scf.if %2 {
      %cst_25 = arith.constant 0.000000e+00 : f32
      %65 = vector.broadcast %cst_25 : f32 to vector<8x128xf32>
      %c0_26 = arith.constant 0 : index
      %c0_27 = arith.constant 0 : index
      %66 = vector.load %arg6[%c0_26, %c0_27] : memref<8x128xf32, #tpu.memory_space<vmem>>, vector<8x128xf32>
      tpu.vector_store %arg6[%c0_26, %c0_27], %65 {strides = array<i32>} : memref<8x128xf32, #tpu.memory_space<vmem>>, vector<8x128xf32>,
    } else {
    }
    %c0 = arith.constant 0 : index
    %c0_1 = arith.constant 0 : index
    %c0_2 = arith.constant 0 : index
    %3 = vector.load %arg3[%c0, %c0_1, %c0_2] : memref<3x8x128xf32, #tpu.memory_space<vmem>>, vector<1x8x128xf32>
    %4 = vector.shape_cast %3 : vector<1x8x128xf32> to vector<8x128xf32>
    %c1 = arith.constant 1 : index
    %c0_3 = arith.constant 0 : index
    %c0_4 = arith.constant 0 : index
    %5 = vector.load %arg3[%c1, %c0_3, %c0_4] : memref<3x8x128xf32, #tpu.memory_space<vmem>>, vector<1x8x128xf32>
    %6 = vector.shape_cast %5 : vector<1x8x128xf32> to vector<8x128xf32>
    %c0_5 = arith.constant 0 : index
    %c0_6 = arith.constant 0 : index
    %c0_7 = arith.constant 0 : index
    %7 = vector.load %arg4[%c0_5, %c0_6, %c0_7] : memref<3x8x128xf32, #tpu.memory_space<vmem>>, vector<1x8x128xf32>
    %8 = vector.shape_cast %7 : vector<1x8x128xf32> to vector<8x128xf32>
    %c1_8 = arith.constant 1 : index
    %c0_9 = arith.constant 0 : index
    %c0_10 = arith.constant 0 : index
    %9 = vector.load %arg4[%c1_8, %c0_9, %c0_10] : memref<3x8x128xf32, #tpu.memory_space<vmem>>, vector<1x8x128xf32>
    %10 = vector.shape_cast %9 : vector<1x8x128xf32> to vector<8x128xf32>
    %c0_11 = arith.constant 0 : index
    %11 = memref.load %arg2[%c0_11] : memref<3xf32, #tpu.memory_space<smem>>
    %12 = vector.broadcast %11 : f32 to vector<8x128xf32>
    %13 = arith.subf %12, %4 : vector<8x128xf32>
    %c1_12 = arith.constant 1 : index
    %14 = memref.load %arg2[%c1_12] : memref<3xf32, #tpu.memory_space<smem>>
    %15 = vector.broadcast %14 : f32 to vector<8x128xf32>
    %16 = arith.subf %15, %6 : vector<8x128xf32>
    %c2 = arith.constant 2 : index
    %c0_13 = arith.constant 0 : index
    %c0_14 = arith.constant 0 : index
    %17 = vector.load %arg3[%c2, %c0_13, %c0_14] : memref<3x8x128xf32, #tpu.memory_space<vmem>>, vector<1x8x128xf32>
    %18 = vector.shape_cast %17 : vector<1x8x128xf32> to vector<8x128xf32>
    %c2_15 = arith.constant 2 : index
    %c0_16 = arith.constant 0 : index
    %c0_17 = arith.constant 0 : index
    %19 = vector.load %arg4[%c2_15, %c0_16, %c0_17] : memref<3x8x128xf32, #tpu.memory_space<vmem>>, vector<1x8x128xf32>
    %20 = vector.shape_cast %19 : vector<1x8x128xf32> to vector<8x128xf32>
    %c2_18 = arith.constant 2 : index
    %21 = memref.load %arg2[%c2_18] : memref<3xf32, #tpu.memory_space<smem>>
    %22 = vector.broadcast %21 : f32 to vector<8x128xf32>
    %23 = arith.subf %22, %18 : vector<8x128xf32>
    %24 = arith.mulf %16, %20 : vector<8x128xf32>
    %25 = arith.mulf %23, %10 : vector<8x128xf32>
    %26 = arith.subf %24, %25 : vector<8x128xf32>
    %27 = arith.mulf %23, %8 : vector<8x128xf32>
    %28 = arith.mulf %13, %20 : vector<8x128xf32>
    %29 = arith.subf %27, %28 : vector<8x128xf32>
    %30 = arith.mulf %13, %10 : vector<8x128xf32>
    %31 = arith.mulf %16, %8 : vector<8x128xf32>
    %32 = arith.subf %30, %31 : vector<8x128xf32>
    %33 = arith.mulf %26, %26 : vector<8x128xf32>
    %34 = arith.mulf %29, %29 : vector<8x128xf32>
    %35 = arith.addf %33, %34 : vector<8x128xf32>
    %36 = arith.mulf %32, %32 : vector<8x128xf32>
    %37 = arith.addf %35, %36 : vector<8x128xf32>
    %38 = math.sqrt %37 : vector<8x128xf32>
    %39 = arith.mulf %8, %8 : vector<8x128xf32>
    %40 = arith.mulf %10, %10 : vector<8x128xf32>
    %41 = arith.addf %39, %40 : vector<8x128xf32>
    %42 = arith.mulf %20, %20 : vector<8x128xf32>
    %43 = arith.addf %41, %42 : vector<8x128xf32>
    %44 = math.rsqrt %43 : vector<8x128xf32>
    %45 = arith.mulf %38, %44 : vector<8x128xf32>
    %c1_i32 = arith.constant 1 : i32
    %46 = arith.muli %arg0, %c1_i32 : i32
    %47 = arith.addi %46, %arg1 : i32
    %c1024_i32 = arith.constant 1024 : i32
    %48 = arith.muli %47, %c1024_i32 : i32
    %49 = tpu.iota {dimensions = array<i32: 0>} : vector<8x128xi32>
    %c128_i32 = arith.constant 128 : i32
    %50 = vector.broadcast %c128_i32 : i32 to vector<8x128xi32>
    %51 = arith.muli %49, %50 : vector<8x128xi32>
    %52 = tpu.iota {dimensions = array<i32: 1>} : vector<8x128xi32>
    %53 = arith.addi %51, %52 : vector<8x128xi32>
    %c200_i32 = arith.constant 200 : i32
    %54 = arith.subi %c200_i32, %48 : i32
    %55 = vector.broadcast %54 : i32 to vector<8x128xi32>
    %56 = arith.cmpi slt, %53, %55 : vector<8x128xi32>
    %cst = arith.constant 0.000000e+00 : f32
    %57 = vector.broadcast %cst : f32 to vector<8x128xf32>
    %58 = arith.select %56, %45, %57 : vector<8x128xi1>, vector<8x128xf32>
    %c0_19 = arith.constant 0 : index
    %c0_20 = arith.constant 0 : index
    %59 = vector.load %arg6[%c0_19, %c0_20] : memref<8x128xf32, #tpu.memory_space<vmem>>, vector<8x128xf32>
    %60 = arith.addf %59, %58 : vector<8x128xf32>
    %c0_21 = arith.constant 0 : index
    %c0_22 = arith.constant 0 : index
    %61 = vector.load %arg6[%c0_21, %c0_22] : memref<8x128xf32, #tpu.memory_space<vmem>>, vector<8x128xf32>
    tpu.vector_store %arg6[%c0_21, %c0_22], %60 {strides = array<i32>} : memref<8x128xf32, #tpu.memory_space<vmem>>, vector<8x128xf32>,
    %c0_i32_23 = arith.constant 0 : i32
    %62 = arith.cmpi eq, %arg1, %c0_i32_23 : i32
    %63 = arith.extui %62 : i1 to i32
    %c0_i32_24 = arith.constant 0 : i32
    %64 = arith.cmpi ne, %63, %c0_i32_24 : i32
    scf.if %64 {
      %c0_25 = arith.constant 0 : index
      %c0_26 = arith.constant 0 : index
      %65 = vector.load %arg6[%c0_25, %c0_26] : memref<8x128xf32, #tpu.memory_space<vmem>>, vector<8x128xf32>
      %66 = vector.shape_cast %65 : vector<8x128xf32> to vector<1x8x128xf32>
      %cst_27 = arith.constant dense<0.000000e+00> : vector<1xf32>
      %67 = vector.multi_reduction <add>, %66, %cst_27 [1, 2] : vector<1x8x128xf32> to vector<1xf32>
      %68 = vector.shape_cast %67 : vector<1xf32> to vector<1x1x1xf32>
      %69 = vector.extract %68[0, 0, 0] : f32 from vector<1x1x1xf32>
      %70 = vector.broadcast %69 : f32 to vector<1x1xf32>
      %c0_28 = arith.constant 0 : index
      %c0_29 = arith.constant 0 : index
      %71 = vector.load %arg5[%c0_28, %c0_29] : memref<1x1xf32, #tpu.memory_space<vmem>>, vector<1x1xf32>
      tpu.vector_store %arg5[%c0_28, %c0_29], %70 {strides = array<i32>} : memref<1x1xf32, #tpu.memory_space<vmem>>, vector<1x1xf32>,
    } else {
    }
    return
  }
  func.func @transform_0(%arg0: i32, %arg1: i32) -> i32 {
    %c0_i32 = arith.constant 0 : i32
    %c0_i32_0 = arith.constant 0 : i32
    return %c0_i32 : i32
  }
  func.func @transform_1(%arg0: i32, %arg1: i32) -> (i32, i32, i32) {
    %c1_i32 = arith.constant 1 : i32
    %0 = arith.muli %arg0, %c1_i32 : i32
    %1 = arith.addi %0, %arg1 : i32
    %c0_i32 = arith.constant 0 : i32
    %c0_i32_0 = arith.constant 0 : i32
    %c0_i32_1 = arith.constant 0 : i32
    return %c0_i32, %1, %c0_i32_0 : i32, i32, i32
  }
  func.func @transform_2(%arg0: i32, %arg1: i32) -> (i32, i32, i32) {
    %c1_i32 = arith.constant 1 : i32
    %0 = arith.muli %arg0, %c1_i32 : i32
    %1 = arith.addi %0, %arg1 : i32
    %c0_i32 = arith.constant 0 : i32
    %c0_i32_0 = arith.constant 0 : i32
    %c0_i32_1 = arith.constant 0 : i32
    return %c0_i32, %1, %c0_i32_0 : i32, i32, i32
  }
  func.func @transform_3(%arg0: i32, %arg1: i32) -> (i32, i32) {
    %c0_i32 = arith.constant 0 : i32
    %c0_i32_0 = arith.constant 0 : i32
    return %arg0, %c0_i32 : i32, i32
  }
}

</mosaic_0001>

<bundles_post_ra>
// kernel: tpu_custom_call.1
= control target key start
LH: loop header
LB: loop body
LE: loop exit
PB: predicated region body
PF: predicated region fallthrough
CT: control target
= control target key end

     0   :  { %8 = vsyncpa [#allocation6], 0  ;;  %s334_s0 = inlined_call_operand.hbm [shape: f32[3], index: 0, kind: input, shape index: {}]   ;;  %s335_s1 = inlined_call_operand.hbm [shape: f32[3,8,128], index: 1, kind: input, shape index: {}]   ;;  %s336_s2 = inlined_call_operand.hbm [shape: f32[3,8,128], index: 2, kind: input, shape index: {}]   ;;  %s337_s3 = inlined_call_operand.hbm [shape: f32[1,1], index: 3, kind: output, shape index: {}]  }
   0x1   :  { %9 = vsyncpa [#allocation4], 0 }
   0x2   :  { %10 = vsyncpa [#allocation9], 0 }
   0x3   :  { %11 = vsyncpa [#allocation5], 0  ;;  %s176_s14 = scalar_lea.hbm %s334_s0, 16 }
   0x4   :  { %p177_p0 = scmp.ne.s32.totalorder %s334_s0, %s176_s14  ;;  %p180_p1 = scmp.lt.u32.totalorder %s176_s14, %s334_s0 }
   0x6   :  { %p182_p2 = pnand %p180_p1, %p177_p0 }
   0x8   :  { %185 = shalt.err (!%p182_p2)
}
   0x9   :  { %s260_s19 = smov [#allocation3]   ;;  %s261_s22 = smov [#allocation7]  }
   0xa   :  { %19 = dma.hbm_to_smem %s334_s0, 16, %s260_s19, [#allocation6]  }
   0xb   :  { %s28_s23 = sshll.u32 %s261_s22, 4  ;;  %s186_s26 = scalar_lea.hbm %s335_s1, 384  ;;  %s29_s23 = int_to_ptr.vmem [resolvable:$true] %s28_s23 }
   0xc   :  { %p187_p3 = scmp.ne.s32.totalorder %s335_s1, %s186_s26  ;;  %p190_p4 = scmp.lt.u32.totalorder %s186_s26, %s335_s1 }
   0xe   :  { %p192_p5 = pnand %p190_p4, %p187_p3 }
  0x10   :  { %195 = shalt.err (!%p192_p5)
}
  0x11   :  { %s196_s4 = scalar_lea.vmem %s29_s23, 384  ;;  %p201_p7 = scmp.lt.s32.totalorder %s29_s23, %s29_s23 }
  0x12   :  { %p197_p6 = scmp.ne.s32.totalorder %s29_s23, %s196_s4  ;;  %p202_p8 = scmp.lt.s32.totalorder %s196_s4, %s196_s4 }
  0x14   :  { %p203_p9 = por %p202_p8, %p201_p7 }
  0x16   :  { %p204_p10 = pnand %p203_p9, %p197_p6 }
  0x18   :  { %207 = shalt.err (!%p204_p10)
}
  0x19   :  { %s262_s0 = smov 128   ;;  %s263_s5 = smov 8  }
  0x1a   :  { %34 = dma.hbm_to_vmem [thread:$0]  %s335_s1, 384, %s29_s23, [#allocation4], %s262_s0, %s262_s0, %s263_s5  }
  0x1b   :  { %s264_s8 = smov [#allocation8]   ;;  %s208_s12 = scalar_lea.hbm %s336_s2, 384 }
  0x1c   :  { %s43_s9 = sshll.u32 %s264_s8, 4  ;;  %p209_p11 = scmp.ne.s32.totalorder %s336_s2, %s208_s12  ;;  %s44_s9 = int_to_ptr.vmem [resolvable:$true] %s43_s9 }
  0x1d   :  { %p212_p12 = scmp.lt.u32.totalorder %s208_s12, %s336_s2 }
  0x1f   :  { %p214_p13 = pnand %p212_p12, %p209_p11 }
  0x21   :  { %217 = shalt.err (!%p214_p13)
}
  0x22   :  { %s218_s17 = scalar_lea.vmem %s44_s9, 384  ;;  %p223_p1 = scmp.lt.s32.totalorder %s44_s9, %s44_s9 }
  0x23   :  { %p219_p0 = scmp.ne.s32.totalorder %s44_s9, %s218_s17  ;;  %p224_p2 = scmp.lt.s32.totalorder %s218_s17, %s218_s17 }
  0x25   :  { %p225_p3 = por %p224_p2, %p223_p1 }
  0x27   :  { %p226_p4 = pnand %p225_p3, %p219_p0 }
  0x29   :  { %229 = shalt.err (!%p226_p4)
}
  0x2a   :  { %49 = dma.hbm_to_vmem [thread:$0]  %s336_s2, 384, %s44_s9, [#allocation9], %s262_s0, %s262_s0, %s263_s5  }
  0x2b   :  { %252 = dma.done.wait [#allocation6], 16  }
  0x2c   :  { %253 = vsyncadd [#allocation6], 4294967280 }
  0x2d   :  { %254 = dma.done.wait [#allocation4], 384  }
  0x2e   :  { %255 = vsyncadd [#allocation4], 4294966912 }
  0x2f   :  { %256 = dma.done.wait [#allocation9], 384  }
  0x30   :  { %257 = vsyncadd [#allocation9], 4294966912 }
  0x31   :  { %59 = sfence }
  0x32   :  { %s73_s19 = sld [smem:[#allocation3]]  ;;  %s162_s20 = sld [smem:[#allocation3 + $0x1]]  ;;  %v67_v0 = vld [vmem:[#allocation7] sm:$0xff]  ;;  %v69_v1 = vld [vmem:[#allocation7 + $0x8] sm:$0xff]  ;;  %v80_v3 = vld [vmem:[#allocation7 + $0x10] sm:$0xff]  ;;  %v116_v31 = vlaneseq  ;;  %vm143_vm3 = vcmask 0  }
  0x33   :  { %s163_s21 = sld [smem:[#allocation3 + $0x2]]  ;;  %v82_v4 = vld [vmem:[#allocation8 + $0x10] sm:$0xff]  ;;  %v70_v7 = vld [vmem:[#allocation8] sm:$0xff]  ;;  %v72_v8 = vld [vmem:[#allocation8 + $0x8] sm:$0xff]  ;;  %s265_s2 = smov [#allocation10]  }
  0x34   :  { %v107_v18 = vmul.f32 %v70_v7, %v70_v7  ;;  %v108_v19 = vmul.f32 %v72_v8, %v72_v8  ;;  %v110_v23 = vmul.f32 %v82_v4, %v82_v4  ;;  %v117_v32 = vshrl.u32 %v116_v31, 7  ;;  %s151_s22 = sshll.u32 %s265_s2, 4  ;;  %s152_s22 = int_to_ptr.vmem [resolvable:$true] %s151_s22 }
  0x35   :  { %v120_v34 = vand.u32 127, %v116_v31  ;;  %s230_s24 = scalar_lea.vmem %s152_s22, 16  ;;  %s234_s25 = scalar_lea.vmem %s152_s22, 32 }
  0x36   :  { %v109_v27 = vadd.f32 %v108_v19, %v107_v18  ;;  %v118_v33 = vmul.u32 128, %v117_v32  ;;  %p231_p5 = scmp.ne.s32.totalorder %s152_s22, %s230_s24  ;;  %p235_p6 = scmp.lt.s32.totalorder %s152_s22, %s152_s22 }
  0x37   :  { %p236_p7 = scmp.lt.s32.totalorder %s234_s25, %s230_s24 }
  0x38   :  { %v74_v2 = vstv %s73_s19  ;;  %v77_v6 = vstv %s162_s20  ;;  %v111_v30 = vadd.f32 %v110_v23, %v109_v27  ;;  %v121_v37 = vadd.s32 %v120_v34, %v118_v33 }
  0x39   :  { %v75_v5 = vsub.f32 %v74_v2, %v67_v0  ;;  %v78_v9 = vsub.f32 %v77_v6, %v69_v1  ;;  %v84_v10 = vstv %s163_s21  ;;  %p237_p8 = por %p236_p7, %p235_p6 }
  0x3a   :  { %v85_v11 = vsub.f32 %v84_v10, %v80_v3  ;;  %vm124_vm2 = vcmp.lt.s32.totalorder %v121_v37, 200 }
  0x3b   :  { %v90_v12 = vmul.f32 %v82_v4, %v75_v5  ;;  %v92_v13 = vmul.f32 %v75_v5, %v72_v8  ;;  %v86_v14 = vmul.f32 %v82_v4, %v78_v9  ;;  %v93_v15 = vmul.f32 %v78_v9, %v70_v7  ;;  %p238_p9 = pnand %p237_p8, %p231_p5 }
  0x3c   :  { %v87_v16 = vmul.f32 %v85_v11, %v72_v8  ;;  %v89_v17 = vmul.f32 %v85_v11, %v70_v7 }
  0x3d   :  { %v94_v20 = vsub.f32 %v92_v13, %v93_v15 }
  0x3e   :  { %v88_v21 = vsub.f32 %v86_v14, %v87_v16  ;;  %v91_v22 = vsub.f32 %v89_v17, %v90_v12 }
  0x3f   :  { %v98_v26 = vmul.f32 %v94_v20, %v94_v20 }
  0x40   :  { %v95_v24 = vmul.f32 %v88_v21, %v88_v21  ;;  %v96_v25 = vmul.f32 %v91_v22, %v91_v22 }
  0x42   :  { %v97_v28 = vadd.f32 %v96_v25, %v95_v24 }
  0x44   :  { %v99_v29 = vadd.f32 %v98_v26, %v97_v28 }
  0x46   :  { %172 = vrsqrt.f32 %v99_v29  ;;  %vm102_vm0 = vcmp.eq.f32.partialorder %v99_v29, inf  ;;  %v105_v36 = vand.u32 2147483648, %v99_v29  ;;  %vm104_vm1 = vcmp.eq.f32.partialorder %v99_v29, 0.0 }
  0x47   :  { %174 = vrsqrt.f32 %v111_v30 }
  0x50   :  { %v173_v35 = vpop.eup %172 }
  0x51   :  { %v101_v38 = vmul.f32 %v173_v35, %v99_v29  ;;  %v175_v39 = vpop.eup %174 }
  0x53   :  { %v103_v40 = vsel %vm102_vm0, %v99_v29, %v101_v38 }
  0x54   :  { %v106_v41 = vsel %vm104_vm1, %v105_v36, %v103_v40 }
  0x55   :  { %v113_v42 = vmul.f32 %v175_v39, %v106_v41 }
  0x57   :  { %v125_v43 = vsel %vm124_vm2, %v113_v42, 0.0 }
  0x58   :  { %133 = vadd.xlane.f32.xlu0 %v125_v43 }
  0xe5   :  { %v134_v44 = vpop.xlane.xlu0 %133 }
  0xe6   :  { %v135_v45 = vrot.slane %v134_v44, 4 }
  0xe8   :  { %v136_v46 = vadd.f32 %v135_v45, %v134_v44 }
  0xea   :  { %v137_v47 = vrot.slane %v136_v46, 2 }
  0xec   :  { %v138_v48 = vadd.f32 %v137_v47, %v136_v46 }
  0xee   :  { %v139_v49 = vrot.slane %v138_v48, 1 }
  0xf0   :  { %v140_v50 = vadd.f32 %v139_v49, %v138_v48 }
  0xf2   :  { %164 = vpush %v140_v50 }
 0x123   :  { %s165_s23 = spop %164 }
 0x124   :  { %v142_v51 = vstv %s165_s23 }
 0x125   :  { %144 = vst.msk [vmem:[#allocation10] sm:$0x1] %vm143_vm3, %v142_v51 }
 0x126   :  { %241 = shalt.err (!%p238_p9)
}
 0x127   :  { %s242_s28 = scalar_lea.hbm %s337_s3, 16 }
 0x128   :  { %p243_p10 = scmp.ne.s32.totalorder %s337_s3, %s242_s28  ;;  %p246_p11 = scmp.lt.u32.totalorder %s242_s28, %s337_s3 }
 0x12a   :  { %p248_p12 = pnand %p246_p11, %p243_p10 }
 0x12c   :  { %251 = shalt.err (!%p248_p12)
}
 0x12d   :  { %154 = dma.vmem_to_hbm [thread:$0]  %s152_s22, 16, %s337_s3, [#allocation5]  }
 0x12e   :  { %258 = dma.done.wait [#allocation5], 16  }
 0x12f   :  { %259 = vsyncadd [#allocation5], 4294967280 }
 0x130   :  { %158 = vsyncpa [#allocation4], 1 }
 0x131   :  { %159 = vsyncpa [#allocation9], 1 }
 0x132   :  { %160 = vsyncpa [#allocation5], 1 }
 0x133   :  { %161 = vsyncpa [#allocation6], 1 }

</bundles_post_ra>
